<compile_context>
chip_gen: v7x
topology: tpu7x:2x2x1
jax: 0.10.0
libtpu: 0.0.40
codegen_flags: <defaults>
</compile_context>

<pallas_src>
import functools

import jax
import jax.numpy as jnp
from jax.experimental import pallas as pl
from jax.experimental.pallas import tpu as pltpu

EPS = 1e-5
LANE = 128


def _round_up(n, m):
    return ((n + m - 1) // m) * m


def cnn1_kernel(x_ref, wc_ref, wf_ref, p_ref, o_ref, *, c_p, n_p):
    # x_ref : (B, CKKp)   flattened input, zero-padded contraction dim
    # wc_ref: (CKKp, Cp)  conv weight (flattened, transposed), zero-padded
    # wf_ref: (Cp, Np)    fc weight (transposed), zero-padded
    # p_ref : (8, Pw)     packed params: row0=gamma, row1=beta, row2=fc bias
    #                     (padded lanes are exactly 0)
    # o_ref : (B, Np)     lane-dense output; wrapper slices [:, :num_classes]
    x = x_ref[...]

    # Conv2d with full-spatial kernel == one MXU matmul over C*K*K.
    # Conv bias intentionally omitted (cancelled by training-mode BN).
    y = jnp.dot(x, wc_ref[...], preferred_element_type=jnp.float32)

    # BatchNorm2d, training-mode semantics: per-channel batch statistics
    # (spatial extent is 1x1), biased variance, eps=1e-5.  Single-pass stats.
    mean = jnp.mean(y, axis=0, keepdims=True)
    mean_sq = jnp.mean(y * y, axis=0, keepdims=True)
    var = mean_sq - mean * mean

    gamma = p_ref[0:1, :c_p]
    beta = p_ref[1:2, :c_p]
    bf = p_ref[2:3, :n_p]

    # Fold gamma into the rsqrt once (rsqrt lands on the EUP slot).
    scale = gamma * jax.lax.rsqrt(var + EPS)          # 0 on padded lanes
    shift = beta - mean * scale
    y = jnp.maximum(y * scale + shift, 0.0)           # BN + ReLU

    # Linear(C, num_classes).  Padded channels of y are exactly 0, padded
    # rows/cols of wf and padded lanes of bf are 0 -> padded output lanes are 0.
    o_ref[...] = jnp.dot(y, wf_ref[...], preferred_element_type=jnp.float32) + bf


def cnn1_forward(x, conv_w, conv_b, bn_gamma, bn_beta, fc_w, fc_b):
    """x: (B, C, K, K) NCHW, spatial == kernel size. Returns (B, num_classes)."""
    del conv_b  # cancelled exactly by training-mode BatchNorm mean subtraction
    B, C, K, _ = x.shape
    num_classes = fc_w.shape[0]
    ckk = C * K * K

    ckk_p = _round_up(ckk, LANE)
    c_p = _round_up(C, LANE)
    n_p = _round_up(num_classes, LANE)
    p_w = max(c_p, n_p)

    # Glue reshapes / zero-padding (plain JAX): make every lane dim 128-dense.
    x_flat = x.reshape(B, ckk).astype(jnp.float32)
    x_pad = jnp.zeros((B, ckk_p), jnp.float32).at[:, :ckk].set(x_flat)

    wc = conv_w.reshape(C, ckk).T.astype(jnp.float32)            # (ckk, C)
    wc_pad = jnp.zeros((ckk_p, c_p), jnp.float32).at[:ckk, :C].set(wc)

    wf = fc_w.T.astype(jnp.float32)                              # (C, num_classes)
    wf_pad = jnp.zeros((c_p, n_p), jnp.float32).at[:C, :num_classes].set(wf)

    # Coalesce the tiny per-channel params into one (8, p_w) array -> one DMA.
    params = jnp.zeros((8, p_w), jnp.float32)
    params = params.at[0, :C].set(bn_gamma.astype(jnp.float32))
    params = params.at[1, :C].set(bn_beta.astype(jnp.float32))
    params = params.at[2, :num_classes].set(fc_b.astype(jnp.float32))

    vmem = pl.BlockSpec(memory_space=pltpu.MemorySpace.VMEM)
    out = pl.pallas_call(
        functools.partial(cnn1_kernel, c_p=c_p, n_p=n_p),
        out_shape=jax.ShapeDtypeStruct((B, n_p), jnp.float32),
        in_specs=[vmem] * 4,
        out_specs=vmem,
    )(x_pad, wc_pad, wf_pad, params)
    return out[:, :num_classes]


if __name__ == "__main__":
    # Shapes consistent with the module: channel_size=4, kernel_size=5,
    # num_classes=10, batch=8; input spatial = kernel_size so conv output is 1x1.
    B, C, K, NUM_CLASSES = 8, 4, 5, 10

    key = jax.random.PRNGKey(0)
    k_x, k_cw, k_cb, k_fw, k_fb = jax.random.split(key, 5)

    x = jax.random.normal(k_x, (B, C, K, K), dtype=jnp.float32)

    # Deterministic parameter init (roughly PyTorch-style uniform fan-in bounds).
    conv_fan_in = C * K * K
    conv_bound = 1.0 / jnp.sqrt(conv_fan_in)
    conv_w = jax.random.uniform(k_cw, (C, C, K, K), minval=-conv_bound,
                                maxval=conv_bound, dtype=jnp.float32)
    conv_b = jax.random.uniform(k_cb, (C,), minval=-conv_bound,
                                maxval=conv_bound, dtype=jnp.float32)

    bn_gamma = jnp.ones((C,), dtype=jnp.float32)
    bn_beta = jnp.zeros((C,), dtype=jnp.float32)

    fc_bound = 1.0 / jnp.sqrt(C)
    fc_w = jax.random.uniform(k_fw, (NUM_CLASSES, C), minval=-fc_bound,
                              maxval=fc_bound, dtype=jnp.float32)
    fc_b = jax.random.uniform(k_fb, (NUM_CLASSES,), minval=-fc_bound,
                              maxval=fc_bound, dtype=jnp.float32)

    out = cnn1_forward(x, conv_w, conv_b, bn_gamma, bn_beta, fc_w, fc_b)
    jax.block_until_ready(out)

    # Pure-JAX reference of the original module forward (training-mode BN,
    # two-pass variance, conv bias included — it cancels, verifying the identity).
    y_ref = jnp.einsum("bckl,ockl->bo", x, conv_w) + conv_b
    m = jnp.mean(y_ref, axis=0, keepdims=True)
    v = jnp.mean((y_ref - m) ** 2, axis=0, keepdims=True)
    y_ref = (y_ref - m) / jnp.sqrt(v + EPS) * bn_gamma + bn_beta
    y_ref = jnp.maximum(y_ref, 0.0)
    ref = y_ref @ fc_w.T + fc_b

    assert out.shape == (B, NUM_CLASSES)
    assert jnp.allclose(out, ref, atol=1e-4, rtol=1e-4)
    print("KERNEL_OK")
</pallas_src>

<mosaic_0001>
module attributes {stable_mosaic.version = 11 : i64} {
  func.func @cnn1_kernel(%arg0: memref<8x128xf32, #tpu.memory_space<vmem>>, %arg1: memref<128x128xf32, #tpu.memory_space<vmem>>, %arg2: memref<128x128xf32, #tpu.memory_space<vmem>>, %arg3: memref<8x128xf32, #tpu.memory_space<vmem>>, %arg4: memref<8x128xf32, #tpu.memory_space<vmem>>) attributes {dimension_semantics = [], scalar_prefetch = 0 : i64, scratch_operands = 0 : i64, tpu.core_type = #tpu.core_type<tc>} {
    %c0 = arith.constant 0 : index
    %c0_0 = arith.constant 0 : index
    %0 = vector.load %arg0[%c0, %c0_0] : memref<8x128xf32, #tpu.memory_space<vmem>>, vector<8x128xf32>
    %c0_1 = arith.constant 0 : index
    %c0_2 = arith.constant 0 : index
    %1 = vector.load %arg1[%c0_1, %c0_2] : memref<128x128xf32, #tpu.memory_space<vmem>>, vector<128x128xf32>
    %cst = arith.constant dense<0.000000e+00> : vector<8x128xf32>
    %2 = tpu.matmul %0, %1, %cst {dimension_numbers = #tpu.dot_dimension_numbers<[1], [0], [0], [1], [0, 0, 1, 1], [], []>} : vector<8x128xf32>, vector<128x128xf32>, vector<8x128xf32> -> vector<8x128xf32>
    %cst_3 = arith.constant dense<0.000000e+00> : vector<128xf32>
    %3 = vector.multi_reduction <add>, %2, %cst_3 [0] : vector<8x128xf32> to vector<128xf32>
    %4 = vector.shape_cast %3 : vector<128xf32> to vector<1x128xf32>
    %cst_4 = arith.constant 8.000000e+00 : f32
    %5 = vector.broadcast %cst_4 : f32 to vector<1x128xf32>
    %6 = arith.divf %4, %5 : vector<1x128xf32>
    %7 = arith.mulf %2, %2 : vector<8x128xf32>
    %cst_5 = arith.constant dense<0.000000e+00> : vector<128xf32>
    %8 = vector.multi_reduction <add>, %7, %cst_5 [0] : vector<8x128xf32> to vector<128xf32>
    %9 = vector.shape_cast %8 : vector<128xf32> to vector<1x128xf32>
    %cst_6 = arith.constant 8.000000e+00 : f32
    %10 = vector.broadcast %cst_6 : f32 to vector<1x128xf32>
    %11 = arith.divf %9, %10 : vector<1x128xf32>
    %12 = arith.mulf %6, %6 : vector<1x128xf32>
    %13 = arith.subf %11, %12 : vector<1x128xf32>
    %c0_7 = arith.constant 0 : index
    %c0_8 = arith.constant 0 : index
    %14 = vector.load %arg3[%c0_7, %c0_8] : memref<8x128xf32, #tpu.memory_space<vmem>>, vector<1x128xf32>
    %c1 = arith.constant 1 : index
    %c0_9 = arith.constant 0 : index
    %15 = vector.load %arg3[%c1, %c0_9] : memref<8x128xf32, #tpu.memory_space<vmem>>, vector<1x128xf32>
    %c2 = arith.constant 2 : index
    %c0_10 = arith.constant 0 : index
    %16 = vector.load %arg3[%c2, %c0_10] : memref<8x128xf32, #tpu.memory_space<vmem>>, vector<1x128xf32>
    %cst_11 = arith.constant 9.99999974E-6 : f32
    %17 = vector.broadcast %cst_11 : f32 to vector<1x128xf32>
    %18 = arith.addf %13, %17 : vector<1x128xf32>
    %19 = math.rsqrt %18 : vector<1x128xf32>
    %20 = arith.mulf %14, %19 : vector<1x128xf32>
    %21 = arith.mulf %6, %20 : vector<1x128xf32>
    %22 = arith.subf %15, %21 : vector<1x128xf32>
    %23 = vector.broadcast %20 : vector<1x128xf32> to vector<8x128xf32>
    %24 = arith.mulf %2, %23 : vector<8x128xf32>
    %25 = vector.broadcast %22 : vector<1x128xf32> to vector<8x128xf32>
    %26 = arith.addf %24, %25 : vector<8x128xf32>
    %cst_12 = arith.constant 0.000000e+00 : f32
    %27 = vector.broadcast %cst_12 : f32 to vector<8x128xf32>
    %28 = arith.maximumf %26, %27 : vector<8x128xf32>
    %c0_13 = arith.constant 0 : index
    %c0_14 = arith.constant 0 : index
    %29 = vector.load %arg2[%c0_13, %c0_14] : memref<128x128xf32, #tpu.memory_space<vmem>>, vector<128x128xf32>
    %cst_15 = arith.constant dense<0.000000e+00> : vector<8x128xf32>
    %30 = tpu.matmul %28, %29, %cst_15 {dimension_numbers = #tpu.dot_dimension_numbers<[1], [0], [0], [1], [0, 0, 1, 1], [], []>} : vector<8x128xf32>, vector<128x128xf32>, vector<8x128xf32> -> vector<8x128xf32>
    %31 = vector.broadcast %16 : vector<1x128xf32> to vector<8x128xf32>
    %32 = arith.addf %30, %31 : vector<8x128xf32>
    %c0_16 = arith.constant 0 : index
    %c0_17 = arith.constant 0 : index
    %33 = vector.load %arg4[%c0_16, %c0_17] : memref<8x128xf32, #tpu.memory_space<vmem>>, vector<8x128xf32>
    tpu.vector_store %arg4[%c0_16, %c0_17], %32 {strides = array<i32>} : memref<8x128xf32, #tpu.memory_space<vmem>>, vector<8x128xf32>,
    return
  }
}

</mosaic_0001>

<bundles_post_ra>
// kernel: tpu_custom_call.1
= control target key start
LH: loop header
LB: loop body
LE: loop exit
PB: predicated region body
PF: predicated region fallthrough
CT: control target
= control target key end

     0   :  { %9 = vsyncpa [#allocation3], 0  ;;  %s659_s0 = inlined_call_operand.hbm [shape: f32[8,128], index: 0, kind: input, shape index: {}]   ;;  %s660_s1 = inlined_call_operand.hbm [shape: f32[128,128], index: 1, kind: input, shape index: {}]   ;;  %s661_s2 = inlined_call_operand.hbm [shape: f32[128,128], index: 2, kind: input, shape index: {}]   ;;  %s662_s3 = inlined_call_operand.vmem [shape: f32[8,128], index: 3, kind: input, shape index: {}]   ;;  %s663_s4 = inlined_call_operand.hbm [shape: f32[8,128], index: 4, kind: output, shape index: {}]  }
   0x1   :  { %10 = vsyncpa [#allocation6], 0 }
   0x2   :  { %11 = vsyncpa [#allocation4], 0  ;;  %s546_s15 = smov [#allocation5]   ;;  %s452_s19 = scalar_lea.hbm %s660_s1, 2048 }
   0x3   :  { %s27_s16 = sshll.u32 %s546_s15, 4  ;;  %p453_p0 = scmp.ne.s32.totalorder %s660_s1, %s452_s19  ;;  %s28_s16 = int_to_ptr.vmem [resolvable:$true] %s27_s16 }
   0x4   :  { %p456_p1 = scmp.lt.u32.totalorder %s452_s19, %s660_s1 }
   0x6   :  { %p458_p2 = pnand %p456_p1, %p453_p0 }
   0x8   :  { %461 = shalt.err (!%p458_p2)
}
   0x9   :  { %s462_s24 = scalar_lea.vmem %s28_s16, 2048  ;;  %p467_p4 = scmp.lt.s32.totalorder %s28_s16, %s28_s16 }
   0xa   :  { %p463_p3 = scmp.ne.s32.totalorder %s28_s16, %s462_s24  ;;  %p468_p5 = scmp.lt.s32.totalorder %s462_s24, %s462_s24 }
   0xc   :  { %p469_p6 = por %p468_p5, %p467_p4 }
   0xe   :  { %p470_p7 = pnand %p469_p6, %p463_p3 }
  0x10   :  { %473 = shalt.err (!%p470_p7)
}
  0x11   :  { %s547_s25 = smov 128   ;;  %s548_s26 = smov 8  }
  0x12   :  { %33 = dma.hbm_to_vmem [thread:$0]  %s660_s1, 2048, %s28_s16, [#allocation6], %s547_s25, %s547_s25, %s548_s26  }
  0x13   :  { %s549_s29 = smov [#allocation2]   ;;  %s550_s5 = smov [#allocation7]  }
  0x14   :  { %s18_s30 = sshll.u32 %s549_s29, 4  ;;  %s39_s6 = sshll.u32 %s550_s5, 4  ;;  %s19_s30 = int_to_ptr.vmem [resolvable:$true] %s18_s30  ;;  %s40_s6 = int_to_ptr.vmem [resolvable:$true] %s39_s6 }
  0x15   :  { %s474_s9 = scalar_lea.hbm %s659_s0, 128 }
  0x16   :  { %p475_p8 = scmp.ne.s32.totalorder %s659_s0, %s474_s9  ;;  %p478_p9 = scmp.lt.u32.totalorder %s474_s9, %s659_s0 }
  0x18   :  { %p480_p10 = pnand %p478_p9, %p475_p8 }
  0x1a   :  { %483 = shalt.err (!%p480_p10)
}
  0x1b   :  { %s484_s1 = scalar_lea.vmem %s19_s30, 128  ;;  %p489_p12 = scmp.lt.s32.totalorder %s19_s30, %s19_s30 }
  0x1c   :  { %p485_p11 = scmp.ne.s32.totalorder %s19_s30, %s484_s1  ;;  %p490_p13 = scmp.lt.s32.totalorder %s484_s1, %s484_s1 }
  0x1e   :  { %p491_p0 = por %p490_p13, %p489_p12 }
  0x20   :  { %p492_p1 = pnand %p491_p0, %p485_p11 }
  0x22   :  { %495 = shalt.err (!%p492_p1)
}
  0x23   :  { %21 = dma.hbm_to_vmem [thread:$0]  %s659_s0, 128, %s19_s30, [#allocation3]  }
  0x24   :  { %s496_s18 = scalar_lea.hbm %s661_s2, 2048 }
  0x25   :  { %p497_p2 = scmp.ne.s32.totalorder %s661_s2, %s496_s18  ;;  %p500_p3 = scmp.lt.u32.totalorder %s496_s18, %s661_s2 }
  0x27   :  { %p502_p4 = pnand %p500_p3, %p497_p2 }
  0x29   :  { %505 = shalt.err (!%p502_p4)
}
  0x2a   :  { %s506_s23 = scalar_lea.vmem %s40_s6, 2048  ;;  %p511_p6 = scmp.lt.s32.totalorder %s40_s6, %s40_s6 }
  0x2b   :  { %p507_p5 = scmp.ne.s32.totalorder %s40_s6, %s506_s23  ;;  %p512_p7 = scmp.lt.s32.totalorder %s506_s23, %s506_s23 }
  0x2d   :  { %p513_p8 = por %p512_p7, %p511_p6 }
  0x2f   :  { %p514_p9 = pnand %p513_p8, %p507_p5 }
  0x31   :  { %517 = shalt.err (!%p514_p9)
}
  0x32   :  { %45 = dma.hbm_to_vmem [thread:$0]  %s661_s2, 2048, %s40_s6, [#allocation6], %s547_s25, %s547_s25, %s548_s26  }
  0x33   :  { %540 = dma.done.wait [#allocation3], 128  }
  0x34   :  { %541 = vsyncadd [#allocation3], 4294967168 }
  0x35   :  { %542 = dma.done.wait [#allocation6], 4096  }
  0x36   :  { %543 = vsyncadd [#allocation6], 4294963200  ;;  %v551_v0 = vmov 0.0|0.0   ;;  %vm552_vm0 = vmmov 0   ;;  %v553_v1 = vmov 0.0   ;;  %v58_v2 = vld [vmem:[#allocation5] sm:$0xff] }
  0x37   :  { %393 = vmatprep.subr.bf16.mxu0 %v551_v0  ;;  %355 = vmatprep.mubr.msk.f32.mxu0 %vm552_vm0, %v553_v1  ;;  %v59_v3 = vld [vmem:[#allocation5 + $0x8] sm:$0xff]  ;;  %v60_v4 = vld [vmem:[#allocation5 + $0x10] sm:$0xff]  ;;  %v61_v6 = vld [vmem:[#allocation5 + $0x18] sm:$0xff]  ;;  %s554_s30 = smov [#allocation8]  }
  0x38   :  { %417 = vmatprep.subr.bf16.mxu1 %v551_v0  ;;  %390 = vmatprep.mubr.msk.f32.mxu1 %vm552_vm0, %v553_v1  ;;  %v394_v5 = vpack.c.bf16 %v59_v3, %v58_v2  ;;  %v397_v7 = vpack.c.bf16 %v61_v6, %v60_v4  ;;  %v62_v8 = vld [vmem:[#allocation5 + $0x20] sm:$0xff]  ;;  %v63_v9 = vld [vmem:[#allocation5 + $0x28] sm:$0xff]  ;;  %v64_v11 = vld [vmem:[#allocation5 + $0x30] sm:$0xff]  ;;  %s278_s5 = sshll.u32 %s554_s30, 4  ;;  %s279_s5 = int_to_ptr.vmem [resolvable:$true] %s278_s5 }
  0x39   :  { %v400_v10 = vpack.c.bf16 %v63_v9, %v62_v8  ;;  %v65_v12 = vld [vmem:[#allocation5 + $0x38] sm:$0xff]  ;;  %v66_v14 = vld [vmem:[#allocation5 + $0x40] sm:$0xff]  ;;  %v67_v15 = vld [vmem:[#allocation5 + $0x48] sm:$0xff]  ;;  %s518_s6 = scalar_lea.vmem %s279_s5, 128  ;;  %p523_p11 = scmp.lt.s32.totalorder %s279_s5, %s279_s5 }
  0x3a   :  { %395 = vmatpush3.bf16.msra.mxu0 %v394_v5  ;;  %v403_v13 = vpack.c.bf16 %v65_v12, %v64_v11  ;;  %v406_v16 = vpack.c.bf16 %v67_v15, %v66_v14  ;;  %v68_v17 = vld [vmem:[#allocation5 + $0x50] sm:$0xff]  ;;  %v69_v18 = vld [vmem:[#allocation5 + $0x58] sm:$0xff]  ;;  %v70_v20 = vld [vmem:[#allocation5 + $0x60] sm:$0xff]  ;;  %p519_p10 = scmp.ne.s32.totalorder %s279_s5, %s518_s6  ;;  %p524_p12 = scmp.lt.s32.totalorder %s518_s6, %s518_s6 }
  0x3b   :  { %396 = vmatprep.subr.bf16.mxu0 %v551_v0  ;;  %v409_v19 = vpack.c.bf16 %v69_v18, %v68_v17  ;;  %v71_v21 = vld [vmem:[#allocation5 + $0x68] sm:$0xff]  ;;  %v72_v23 = vld [vmem:[#allocation5 + $0x70] sm:$0xff]  ;;  %v73_v24 = vld [vmem:[#allocation5 + $0x78] sm:$0xff] }
  0x3c   :  { %v412_v22 = vpack.c.bf16 %v71_v21, %v70_v20  ;;  %v415_v25 = vpack.c.bf16 %v73_v24, %v72_v23  ;;  %v57_v26 = vld [vmem:[#allocation2] sm:$0xff]  ;;  %v181_v27 = vld [vmem:[#allocation7] sm:$0xff]  ;;  %v182_v28 = vld [vmem:[#allocation7 + $0x8] sm:$0xff]  ;;  %p525_p13 = por %p524_p12, %p523_p11 }
  0x3d   :  { %v418_v29 = vpack.c.bf16 %v182_v28, %v181_v27  ;;  %v183_v30 = vld [vmem:[#allocation7 + $0x10] sm:$0xff]  ;;  %v184_v31 = vld [vmem:[#allocation7 + $0x18] sm:$0xff]  ;;  %v185_v33 = vld [vmem:[#allocation7 + $0x20] sm:$0xff] }
  0x3e   :  { %398 = vmatpush3.bf16.msra.mxu0 %v397_v7  ;;  %v421_v32 = vpack.c.bf16 %v184_v31, %v183_v30  ;;  %v186_v34 = vld [vmem:[#allocation7 + $0x28] sm:$0xff]  ;;  %v187_v36 = vld [vmem:[#allocation7 + $0x30] sm:$0xff]  ;;  %v188_v37 = vld [vmem:[#allocation7 + $0x38] sm:$0xff]  ;;  %v170_v7 = vlaneseq  ;;  %p526_p0 = pnand %p525_p13, %p519_p10 }
  0x3f   :  { %399 = vmatprep.subr.bf16.mxu0 %v551_v0  ;;  %419 = vmatpush3.bf16.msra.mxu1 %v418_v29  ;;  %v424_v35 = vpack.c.bf16 %v186_v34, %v185_v33  ;;  %v427_v38 = vpack.c.bf16 %v188_v37, %v187_v36  ;;  %v189_v39 = vld [vmem:[#allocation7 + $0x40] sm:$0xff]  ;;  %v190_v40 = vld [vmem:[#allocation7 + $0x48] sm:$0xff]  ;;  %v191_v42 = vld [vmem:[#allocation7 + $0x50] sm:$0xff] }
  0x40   :  { %420 = vmatprep.subr.bf16.mxu1 %v551_v0  ;;  %v430_v41 = vpack.c.bf16 %v190_v40, %v189_v39  ;;  %v192_v43 = vld [vmem:[#allocation7 + $0x58] sm:$0xff]  ;;  %v193_v45 = vld [vmem:[#allocation7 + $0x60] sm:$0xff]  ;;  %v194_v46 = vld [vmem:[#allocation7 + $0x68] sm:$0xff]  ;;  %v171_v8 = vshrl.u32 %v170_v7, 7 }
  0x41   :  { %v433_v44 = vpack.c.bf16 %v192_v43, %v191_v42  ;;  %v436_v47 = vpack.c.bf16 %v194_v46, %v193_v45  ;;  %v195_v48 = vld [vmem:[#allocation7 + $0x70] sm:$0xff]  ;;  %v196_v49 = vld [vmem:[#allocation7 + $0x78] sm:$0xff] }
  0x42   :  { %401 = vmatpush3.bf16.msra.mxu0 %v400_v10  ;;  %v439_v50 = vpack.c.bf16 %v196_v49, %v195_v48  ;;  %v162_v9 = vld [vmem:[%s662_s3] sm:$0x1]  ;;  %v172_v10 = vsub.s32 0, %v171_v8  ;;  %v288_v21 = vld [vmem:[%s662_s3 + $0x2] ss:$0 sm:$0xff] }
  0x43   :  { %402 = vmatprep.subr.bf16.mxu0 %v551_v0  ;;  %422 = vmatpush3.bf16.msra.mxu1 %v421_v32 }
  0x44   :  { %423 = vmatprep.subr.bf16.mxu1 %v551_v0 }
  0x46   :  { %404 = vmatpush3.bf16.msra.mxu0 %v403_v13  ;;  %v163_v13 = vld [vmem:[%s662_s3 + $0x1] sm:$0x1] }
  0x47   :  { %405 = vmatprep.subr.bf16.mxu0 %v551_v0  ;;  %425 = vmatpush3.bf16.msra.mxu1 %v424_v35 }
  0x48   :  { %426 = vmatprep.subr.bf16.mxu1 %v551_v0 }
  0x4a   :  { %407 = vmatpush3.bf16.msra.mxu0 %v406_v16 }
  0x4b   :  { %408 = vmatprep.subr.bf16.mxu0 %v551_v0  ;;  %428 = vmatpush3.bf16.msra.mxu1 %v427_v38 }
  0x4c   :  { %429 = vmatprep.subr.bf16.mxu1 %v551_v0 }
  0x4e   :  { %410 = vmatpush3.bf16.msra.mxu0 %v409_v19 }
  0x4f   :  { %411 = vmatprep.subr.bf16.mxu0 %v551_v0  ;;  %431 = vmatpush3.bf16.msra.mxu1 %v430_v41 }
  0x50   :  { %432 = vmatprep.subr.bf16.mxu1 %v551_v0 }
  0x52   :  { %413 = vmatpush3.bf16.msra.mxu0 %v412_v22 }
  0x53   :  { %414 = vmatprep.subr.bf16.mxu0 %v551_v0  ;;  %434 = vmatpush3.bf16.msra.mxu1 %v433_v44 }
  0x54   :  { %435 = vmatprep.subr.bf16.mxu1 %v551_v0 }
  0x56   :  { %416 = vmatpush3.bf16.msra.mxu0 %v415_v25 }
  0x57   :  { %437 = vmatpush3.bf16.msra.mxu1 %v436_v47 }
  0x58   :  { %438 = vmatprep.subr.bf16.mxu1 %v551_v0 }
  0x59   :  { %356 = vmatmul.mubr.f32.vlgmr.msra.gmra.mrb[0].mxu0 %v57_v26 }
  0x5b   :  { %440 = vmatpush3.bf16.msra.mxu1 %v439_v50 }
 0x12c   :  { %v140_v51 = vpop.f32.mrb[0].mxu0 }
 0x12d   :  { %v144_v52 = vrot.slane %v140_v51, 4  ;;  %v152_v53 = vmul.f32 %v140_v51, %v140_v51  ;;  %v357_v54 = vpop.f32.mrb[1].mxu0 }
 0x12f   :  { %v145_v55 = vadd.f32 %v144_v52, %v140_v51  ;;  %v153_v56 = vrot.slane %v152_v53, 4 }
 0x131   :  { %v146_v57 = vrot.slane %v145_v55, 2  ;;  %v154_v58 = vadd.f32 %v153_v56, %v152_v53 }
 0x133   :  { %v147_v59 = vadd.f32 %v146_v57, %v145_v55  ;;  %v155_v60 = vrot.slane %v154_v58, 2 }
 0x135   :  { %v148_v61 = vrot.slane %v147_v59, 1  ;;  %v156_v62 = vadd.f32 %v155_v60, %v154_v58 }
 0x137   :  { %v149_v63 = vadd.f32 %v148_v61, %v147_v59  ;;  %v157_v1 = vrot.slane %v156_v62, 1 }
 0x139   :  { %v151_v2 = vmul.f32 0.125, %v149_v63  ;;  %v158_v3 = vadd.f32 %v157_v1, %v156_v62 }
 0x13b   :  { %v159_v4 = vmul.f32 0.125, %v158_v3  ;;  %v160_v5 = vmul.f32 %v151_v2, %v151_v2 }
 0x13d   :  { %v161_v0 = vsub.f32 %v159_v4, %v160_v5 }
 0x13f   :  { %v165_v6 = vadd.f32 1e-05, %v161_v0 }
 0x141   :  { %450 = vrsqrt.f32 %v165_v6 }
 0x14b   :  { %v451_v11 = vpop.eup %450 }
 0x14c   :  { %v167_v12 = vmul.f32 %v451_v11, %v162_v9 }
 0x14e   :  { %v173_v14 = vrot.slane %v167_v12, %v172_v10  ;;  %v168_v15 = vmul.f32 %v167_v12, %v151_v2 }
 0x150   :  { %v169_v16 = vsub.f32 %v163_v13, %v168_v15  ;;  %v174_v17 = vmul.f32 %v173_v14, %v140_v51 }
 0x152   :  { %v178_v18 = vrot.slane %v169_v16, %v172_v10 }
 0x154   :  { %v179_v19 = vadd.f32 %v178_v18, %v174_v17 }
 0x156   :  { %v180_v20 = vmax.f32 %v179_v19, 0.0 }
 0x158   :  { %391 = vmatmul.mubr.f32.vlgmr.msra.gmra.mrb[0].mxu1 %v180_v20 }
 0x22b   :  { %v267_v22 = vpop.f32.mrb[0].mxu1 }
 0x22c   :  { %v268_v23 = vadd.f32 %v288_v21, %v267_v22  ;;  %v392_v24 = vpop.f32.mrb[1].mxu1 }
 0x22e   :  { %271 = vst [vmem:[#allocation8] sm:$0xff] %v268_v23 }
 0x22f   :  { %529 = shalt.err (!%p526_p0)
}
 0x230   :  { %s530_s9 = scalar_lea.hbm %s663_s4, 128 }
 0x231   :  { %p531_p1 = scmp.ne.s32.totalorder %s663_s4, %s530_s9  ;;  %p534_p2 = scmp.lt.u32.totalorder %s530_s9, %s663_s4 }
 0x233   :  { %p536_p3 = pnand %p534_p2, %p531_p1 }
 0x235   :  { %539 = shalt.err (!%p536_p3)
}
 0x236   :  { %281 = dma.vmem_to_hbm [thread:$0]  %s279_s5, 128, %s663_s4, [#allocation4]  }
 0x237   :  { %544 = dma.done.wait [#allocation4], 128  }
 0x238   :  { %545 = vsyncadd [#allocation4], 4294967168 }
 0x239   :  { %285 = vsyncpa [#allocation3], 1 }
 0x23a   :  { %286 = vsyncpa [#allocation6], 1 }
 0x23b   :  { %287 = vsyncpa [#allocation4], 1 }

</bundles_post_ra>
